<compile_context>
chip_gen: v7x
topology: tpu7x:2x2x1
jax: 0.10.0
libtpu: 0.0.40
codegen_flags: <defaults>
</compile_context>

<pallas_src>
import functools

import jax
import jax.numpy as jnp
from jax.experimental import pallas as pl
from jax.experimental.pallas import tpu as pltpu


def _round_up(x, m):
    return ((x + m - 1) // m) * m


def _device_info():
    """Best-effort generation detection -> (is_v7x, vmem cap for scoped limit)."""
    kind = ""
    try:
        kind = jax.devices()[0].device_kind.lower()
    except Exception:  # pragma: no cover - defensive
        pass
    is_v7 = ("v7" in kind) or ("7x" in kind)
    vmem_cap = (48 << 20) if is_v7 else (96 << 20)
    return is_v7, vmem_cap


def _layer_norm_epilogue(r, gamma, beta, *, eps, d_real, d_pad):
    """LayerNorm over the lane axis; padded lanes (zero in r) are masked out."""
    inv_d = 1.0 / d_real
    mean = jnp.sum(r, axis=-1, keepdims=True) * inv_d  # padded lanes of r are 0
    cen = r - mean
    if d_pad != d_real:
        lane = jax.lax.broadcasted_iota(jnp.int32, cen.shape, 1)
        cen = jnp.where(lane < d_real, cen, 0.0)       # keep pad out of variance
    var = jnp.sum(cen * cen, axis=-1, keepdims=True) * inv_d
    return cen * jax.lax.rsqrt(var + eps) * gamma + beta   # rsqrt -> EUP slot


# --------------------------------------------------------------------------
# Kernel bodies
# --------------------------------------------------------------------------
def _ffn_kernel_resident(x_ref, w1_ref, b1_ref, w2_ref, b2_ref, g_ref, beta_ref,
                         o_ref, *, eps, d_real, d_pad, mxu_dtype):
    """1-D grid over row tiles; full W1/W2 resident in VMEM, single-shot FFN."""
    x = x_ref[...]
    xm = x if mxu_dtype is None else x.astype(mxu_dtype)
    h = jnp.dot(xm, w1_ref[...], preferred_element_type=jnp.float32)
    h = jnp.maximum(h + b1_ref[...], 0.0)                       # ReLU, f32
    y = jnp.dot(h.astype(w2_ref.dtype), w2_ref[...],
                preferred_element_type=jnp.float32)
    r = x.astype(jnp.float32) + y + b2_ref[...]                 # residual
    out = _layer_norm_epilogue(r, g_ref[...], beta_ref[...],
                               eps=eps, d_real=d_real, d_pad=d_pad)
    o_ref[...] = out.astype(o_ref.dtype)


def _ffn_kernel_chunked(x_ref, w1_ref, b1_ref, w2_ref, b2_ref, g_ref, beta_ref,
                        o_ref, acc_ref, *, eps, d_real, d_pad, mxu_dtype):
    """Fallback 2-D grid (rows, ff-chunks); ff is the innermost reduction axis."""
    k = pl.program_id(1)
    x = x_ref[...]

    @pl.when(k == 0)
    def _():
        # Fold residual + b2 into the accumulator so the epilogue is just LN.
        acc_ref[...] = x.astype(jnp.float32) + b2_ref[...]

    xm = x if mxu_dtype is None else x.astype(mxu_dtype)
    h = jnp.dot(xm, w1_ref[...], preferred_element_type=jnp.float32)
    h = jnp.maximum(h + b1_ref[...], 0.0)
    acc_ref[...] += jnp.dot(h.astype(w2_ref.dtype), w2_ref[...],
                            preferred_element_type=jnp.float32)

    @pl.when(k == pl.num_programs(1) - 1)
    def _():
        out = _layer_norm_epilogue(acc_ref[...], g_ref[...], beta_ref[...],
                                   eps=eps, d_real=d_real, d_pad=d_pad)
        o_ref[...] = out.astype(o_ref.dtype)


# --------------------------------------------------------------------------
# Parameter preparation (done once, not per forward)
# --------------------------------------------------------------------------
def prepare_ffn_params(w1, b1, w2, b2, gamma, beta, *, mxu_dtype=None):
    """Pad params to lane-dense shapes once.  mxu_dtype (e.g. jnp.bfloat16)
    optionally pre-casts the weight matrices for the MXU; biases / LN params
    are kept in f32."""
    D, F = w1.shape
    d_pad = _round_up(D, 128)
    f_pad = _round_up(F, 128)
    w_dtype = w1.dtype if mxu_dtype is None else mxu_dtype
    w1p = jnp.pad(w1.astype(w_dtype), ((0, d_pad - D), (0, f_pad - F)))
    w2p = jnp.pad(w2.astype(w_dtype), ((0, f_pad - F), (0, d_pad - D)))
    b1r = jnp.pad(b1.astype(jnp.float32), (0, f_pad - F)).reshape(1, f_pad)
    b2r = jnp.pad(b2.astype(jnp.float32), (0, d_pad - D)).reshape(1, d_pad)
    gr = jnp.pad(gamma.astype(jnp.float32), (0, d_pad - D)).reshape(1, d_pad)
    br = jnp.pad(beta.astype(jnp.float32), (0, d_pad - D)).reshape(1, d_pad)
    return dict(w1=w1p, b1=b1r, w2=w2p, b2=b2r, gamma=gr, beta=br,
                d_real=D, f_real=F, d_pad=d_pad, f_pad=f_pad,
                mxu_dtype=mxu_dtype)


# --------------------------------------------------------------------------
# Forward
# --------------------------------------------------------------------------
def ffn_forward_prepared(tgt, params, *, eps=1e-5, tile_m=512, tile_f=512):
    """tgt: (S, B, d_model) -> (S, B, d_model)."""
    S, B, D = tgt.shape
    assert D == params["d_real"], "d_model mismatch with prepared params"
    d_pad, f_pad = params["d_pad"], params["f_pad"]
    mxu_dtype = params["mxu_dtype"]
    N = S * B

    is_v7, vmem_cap = _device_info()

    # ---- row tile selection -------------------------------------------------
    tile_m = _round_up(max(8, min(tile_m, _round_up(N, 8))), 8)
    if is_v7:
        # >= 2 row tiles so the 'parallel' axis shards across both TensorCores.
        tile_m = min(tile_m, max(8, _round_up(-(-N // 2), 128)))
    n_pad = _round_up(N, tile_m)

    # ---- activation slab (pad only when necessary) ---------------------------
    x2d = tgt.reshape(N, D)
    pad_n, pad_d = n_pad - N, d_pad - D
    if pad_n or pad_d:
        x2d = jnp.pad(x2d, ((0, pad_n), (0, pad_d)))

    x_isz = jnp.dtype(tgt.dtype).itemsize
    w_isz = jnp.dtype(params["w1"].dtype).itemsize

    # ---- footprint estimate for the weight-resident (1-D grid) path ----------
    est_resident = (
        2 * 2 * tile_m * d_pad * x_isz              # x in / out tiles (double-buffered)
        + 2 * 2 * d_pad * f_pad * w_isz             # W1 + W2 resident (buffer pair counted)
        + 2 * (f_pad + 3 * d_pad) * 4               # biases / LN params (f32)
        + tile_m * f_pad * 4                        # full hidden activation (f32)
        + 3 * tile_m * d_pad * 4                    # residual / LN temporaries (f32)
    )
    limit_resident = 2 * est_resident + (16 << 20)
    use_resident = limit_resident <= vmem_cap

    common_args = (x2d, params["w1"], params["b1"], params["w2"], params["b2"],
                   params["gamma"], params["beta"])

    if use_resident:
        grid = (n_pad // tile_m,)
        kernel = functools.partial(_ffn_kernel_resident, eps=eps, d_real=D,
                                   d_pad=d_pad, mxu_dtype=mxu_dtype)
        out2d = pl.pallas_call(
            kernel,
            out_shape=jax.ShapeDtypeStruct((n_pad, d_pad), tgt.dtype),
            grid_spec=pltpu.PrefetchScalarGridSpec(
                num_scalar_prefetch=0,
                grid=grid,
                in_specs=[
                    pl.BlockSpec((tile_m, d_pad), lambda i: (i, 0)),   # x rows
                    pl.BlockSpec((d_pad, f_pad),  lambda i: (0, 0)),   # W1 (resident)
                    pl.BlockSpec((1, f_pad),      lambda i: (0, 0)),   # b1
                    pl.BlockSpec((f_pad, d_pad),  lambda i: (0, 0)),   # W2 (resident)
                    pl.BlockSpec((1, d_pad),      lambda i: (0, 0)),   # b2
                    pl.BlockSpec((1, d_pad),      lambda i: (0, 0)),   # gamma
                    pl.BlockSpec((1, d_pad),      lambda i: (0, 0)),   # beta
                ],
                out_specs=pl.BlockSpec((tile_m, d_pad), lambda i: (i, 0)),
            ),
            compiler_params=pltpu.CompilerParams(
                dimension_semantics=("parallel",),
                vmem_limit_bytes=int(min(limit_resident, vmem_cap)),
            ),
        )(*common_args)
    else:
        # ---- ff-chunked fallback (very large dim_feedforward) ----------------
        tf = max(128, (min(tile_f, f_pad) // 128) * 128)
        while f_pad % tf:          # pick a 128-multiple that divides f_pad
            tf -= 128
        grid = (n_pad // tile_m, f_pad // tf)
        est = (2 * 2 * tile_m * d_pad * x_isz
               + 2 * 2 * d_pad * tf * w_isz          # W1 / W2 ff-chunks
               + 2 * (tf + 3 * d_pad) * 4
               + tile_m * d_pad * 4                  # f32 accumulator scratch
               + tile_m * tf * 4                     # hidden chunk (f32)
               + 2 * tile_m * d_pad * 4)
        limit = int(min(2 * est + (16 << 20), vmem_cap))
        kernel = functools.partial(_ffn_kernel_chunked, eps=eps, d_real=D,
                                   d_pad=d_pad, mxu_dtype=mxu_dtype)
        out2d = pl.pallas_call(
            kernel,
            out_shape=jax.ShapeDtypeStruct((n_pad, d_pad), tgt.dtype),
            grid_spec=pltpu.PrefetchScalarGridSpec(
                num_scalar_prefetch=0,
                grid=grid,
                in_specs=[
                    pl.BlockSpec((tile_m, d_pad), lambda i, k: (i, 0)),   # x rows
                    pl.BlockSpec((d_pad, tf),     lambda i, k: (0, k)),   # W1 ff-chunk
                    pl.BlockSpec((1, tf),         lambda i, k: (0, k)),   # b1 ff-chunk
                    pl.BlockSpec((tf, d_pad),     lambda i, k: (k, 0)),   # W2 ff-chunk
                    pl.BlockSpec((1, d_pad),      lambda i, k: (0, 0)),   # b2
                    pl.BlockSpec((1, d_pad),      lambda i, k: (0, 0)),   # gamma
                    pl.BlockSpec((1, d_pad),      lambda i, k: (0, 0)),   # beta
                ],
                out_specs=pl.BlockSpec((tile_m, d_pad), lambda i, k: (i, 0)),
                scratch_shapes=[pltpu.VMEM((tile_m, d_pad), jnp.float32)],
            ),
            compiler_params=pltpu.CompilerParams(
                dimension_semantics=("parallel", "arbitrary"),
                vmem_limit_bytes=limit,
            ),
        )(*common_args)

    if pad_n or pad_d:
        out2d = out2d[:N, :D]
    return out2d.reshape(S, B, D)


def make_ffn_layer(w1, b1, w2, b2, gamma, beta, *, eps=1e-5, tile_m=512,
                   tile_f=512, mxu_dtype=None):
    """Pad/cast params once; returns tgt -> FFN(tgt)."""
    params = prepare_ffn_params(w1, b1, w2, b2, gamma, beta, mxu_dtype=mxu_dtype)

    def forward(tgt):
        return ffn_forward_prepared(tgt, params, eps=eps, tile_m=tile_m,
                                    tile_f=tile_f)

    return forward


def ffn_layer_forward(tgt, w1, b1, w2, b2, gamma, beta, *, eps=1e-5,
                      tile_m=512, tile_f=512, mxu_dtype=None):
    """One-shot convenience wrapper (prepares params per call)."""
    return make_ffn_layer(w1, b1, w2, b2, gamma, beta, eps=eps, tile_m=tile_m,
                          tile_f=tile_f, mxu_dtype=mxu_dtype)(tgt)


# --------------------------------------------------------------------------
# Reference + demo
# --------------------------------------------------------------------------
def _xavier_uniform(key, fan_in, fan_out, dtype=jnp.float32):
    limit = (6.0 / (fan_in + fan_out)) ** 0.5
    return jax.random.uniform(key, (fan_in, fan_out), dtype=dtype,
                              minval=-limit, maxval=limit)


def _reference(tgt, w1, b1, w2, b2, gamma, beta, eps=1e-5):
    h = jnp.maximum(tgt @ w1 + b1, 0.0)
    tgt2 = h @ w2 + b2
    r = tgt + tgt2
    mean = jnp.mean(r, axis=-1, keepdims=True)
    var = jnp.mean((r - mean) ** 2, axis=-1, keepdims=True)
    return (r - mean) / jnp.sqrt(var + eps) * gamma + beta


if __name__ == "__main__":
    # Small shapes consistent with the decoder FFN: seq=8, batch=2,
    # d_model=32, dim_feedforward=64.
    S, B, D, FF = 8, 2, 32, 64

    key = jax.random.PRNGKey(0)
    k_x, k_w1, k_w2 = jax.random.split(key, 3)

    tgt = jax.random.normal(k_x, (S, B, D), dtype=jnp.float32)

    # PyTorch Linear weight is (out, in); stored transposed (in, out) for x @ W.
    w1 = _xavier_uniform(k_w1, D, FF)          # linear1: d_model -> dim_feedforward
    b1 = jnp.zeros((FF,), jnp.float32)
    w2 = _xavier_uniform(k_w2, FF, D)          # linear2: dim_feedforward -> d_model
    b2 = jnp.zeros((D,), jnp.float32)
    gamma = jnp.ones((D,), jnp.float32)        # LayerNorm weight
    beta = jnp.zeros((D,), jnp.float32)        # LayerNorm bias

    # Params padded once; mxu_dtype=jnp.bfloat16 is available for bf16 MXU on
    # v6e/v7x but the demo keeps f32 to match the f32 reference bit-tightly.
    ffn = jax.jit(make_ffn_layer(w1, b1, w2, b2, gamma, beta))
    out = jax.block_until_ready(ffn(tgt))

    ref = _reference(tgt, w1, b1, w2, b2, gamma, beta)
    assert out.shape == tgt.shape and out.dtype == tgt.dtype
    assert jnp.allclose(out, ref, atol=2e-5, rtol=2e-5), \
        float(jnp.max(jnp.abs(out - ref)))

    print("KERNEL_OK")
</pallas_src>

<mosaic_0001>
module attributes {stable_mosaic.version = 11 : i64} {
  func.func @_ffn_kernel_resident(%arg0: i32, %arg1: memref<16x128xf32, #tpu.memory_space<vmem>>, %arg2: memref<128x128xf32, #tpu.memory_space<vmem>>, %arg3: memref<1x128xf32, #tpu.memory_space<vmem>>, %arg4: memref<128x128xf32, #tpu.memory_space<vmem>>, %arg5: memref<1x128xf32, #tpu.memory_space<vmem>>, %arg6: memref<1x128xf32, #tpu.memory_space<vmem>>, %arg7: memref<1x128xf32, #tpu.memory_space<vmem>>, %arg8: memref<16x128xf32, #tpu.memory_space<vmem>>) attributes {dimension_semantics = [#tpu.dimension_semantics<parallel>], iteration_bounds = array<i64: 1>, scalar_prefetch = 0 : i64, scratch_operands = 0 : i64, tpu.core_type = #tpu.core_type<tc>, window_params = [{transform_indices = @transform_0, window_bounds = array<i64: 16, 128>}, {pipeline_mode = #tpu.pipeline_mode<synchronous>, transform_indices = @transform_1, window_bounds = array<i64: 128, 128>}, {pipeline_mode = #tpu.pipeline_mode<synchronous>, transform_indices = @transform_2, window_bounds = array<i64: 1, 128>}, {pipeline_mode = #tpu.pipeline_mode<synchronous>, transform_indices = @transform_3, window_bounds = array<i64: 128, 128>}, {pipeline_mode = #tpu.pipeline_mode<synchronous>, transform_indices = @transform_4, window_bounds = array<i64: 1, 128>}, {pipeline_mode = #tpu.pipeline_mode<synchronous>, transform_indices = @transform_5, window_bounds = array<i64: 1, 128>}, {pipeline_mode = #tpu.pipeline_mode<synchronous>, transform_indices = @transform_6, window_bounds = array<i64: 1, 128>}, {transform_indices = @transform_7, window_bounds = array<i64: 16, 128>}]} {
    %c0 = arith.constant 0 : index
    %c0_0 = arith.constant 0 : index
    %0 = vector.load %arg1[%c0, %c0_0] : memref<16x128xf32, #tpu.memory_space<vmem>>, vector<16x128xf32>
    %c0_1 = arith.constant 0 : index
    %c0_2 = arith.constant 0 : index
    %1 = vector.load %arg2[%c0_1, %c0_2] : memref<128x128xf32, #tpu.memory_space<vmem>>, vector<128x128xf32>
    %cst = arith.constant dense<0.000000e+00> : vector<16x128xf32>
    %2 = tpu.matmul %0, %1, %cst {dimension_numbers = #tpu.dot_dimension_numbers<[1], [0], [0], [1], [0, 0, 1, 1], [], []>} : vector<16x128xf32>, vector<128x128xf32>, vector<16x128xf32> -> vector<16x128xf32>
    %c0_3 = arith.constant 0 : index
    %c0_4 = arith.constant 0 : index
    %3 = vector.load %arg3[%c0_3, %c0_4] : memref<1x128xf32, #tpu.memory_space<vmem>>, vector<1x128xf32>
    %4 = vector.broadcast %3 : vector<1x128xf32> to vector<16x128xf32>
    %5 = arith.addf %2, %4 : vector<16x128xf32>
    %cst_5 = arith.constant 0.000000e+00 : f32
    %6 = vector.broadcast %cst_5 : f32 to vector<16x128xf32>
    %7 = arith.maximumf %5, %6 : vector<16x128xf32>
    %c0_6 = arith.constant 0 : index
    %c0_7 = arith.constant 0 : index
    %8 = vector.load %arg4[%c0_6, %c0_7] : memref<128x128xf32, #tpu.memory_space<vmem>>, vector<128x128xf32>
    %cst_8 = arith.constant dense<0.000000e+00> : vector<16x128xf32>
    %9 = tpu.matmul %7, %8, %cst_8 {dimension_numbers = #tpu.dot_dimension_numbers<[1], [0], [0], [1], [0, 0, 1, 1], [], []>} : vector<16x128xf32>, vector<128x128xf32>, vector<16x128xf32> -> vector<16x128xf32>
    %10 = arith.addf %0, %9 : vector<16x128xf32>
    %c0_9 = arith.constant 0 : index
    %c0_10 = arith.constant 0 : index
    %11 = vector.load %arg5[%c0_9, %c0_10] : memref<1x128xf32, #tpu.memory_space<vmem>>, vector<1x128xf32>
    %12 = vector.broadcast %11 : vector<1x128xf32> to vector<16x128xf32>
    %13 = arith.addf %10, %12 : vector<16x128xf32>
    %c0_11 = arith.constant 0 : index
    %c0_12 = arith.constant 0 : index
    %14 = vector.load %arg6[%c0_11, %c0_12] : memref<1x128xf32, #tpu.memory_space<vmem>>, vector<1x128xf32>
    %c0_13 = arith.constant 0 : index
    %c0_14 = arith.constant 0 : index
    %15 = vector.load %arg7[%c0_13, %c0_14] : memref<1x128xf32, #tpu.memory_space<vmem>>, vector<1x128xf32>
    %cst_15 = arith.constant dense<0.000000e+00> : vector<16xf32>
    %16 = vector.multi_reduction <add>, %13, %cst_15 [1] : vector<16x128xf32> to vector<16xf32>
    %17 = vector.shape_cast %16 : vector<16xf32> to vector<16x1xf32>
    %cst_16 = arith.constant 3.125000e-02 : f32
    %18 = vector.broadcast %cst_16 : f32 to vector<16x1xf32>
    %19 = arith.mulf %17, %18 : vector<16x1xf32>
    %20 = vector.broadcast %19 : vector<16x1xf32> to vector<16x128xf32>
    %21 = arith.subf %13, %20 : vector<16x128xf32>
    %22 = tpu.iota {dimensions = array<i32: 1>} : vector<16x128xi32>
    %c32_i32 = arith.constant 32 : i32
    %23 = vector.broadcast %c32_i32 : i32 to vector<16x128xi32>
    %24 = arith.cmpi slt, %22, %23 : vector<16x128xi32>
    %cst_17 = arith.constant 0.000000e+00 : f32
    %25 = vector.broadcast %cst_17 : f32 to vector<16x128xf32>
    %26 = arith.select %24, %21, %25 : vector<16x128xi1>, vector<16x128xf32>
    %27 = arith.mulf %26, %26 : vector<16x128xf32>
    %cst_18 = arith.constant dense<0.000000e+00> : vector<16xf32>
    %28 = vector.multi_reduction <add>, %27, %cst_18 [1] : vector<16x128xf32> to vector<16xf32>
    %29 = vector.shape_cast %28 : vector<16xf32> to vector<16x1xf32>
    %cst_19 = arith.constant 3.125000e-02 : f32
    %30 = vector.broadcast %cst_19 : f32 to vector<16x1xf32>
    %31 = arith.mulf %29, %30 : vector<16x1xf32>
    %cst_20 = arith.constant 9.99999974E-6 : f32
    %32 = vector.broadcast %cst_20 : f32 to vector<16x1xf32>
    %33 = arith.addf %31, %32 : vector<16x1xf32>
    %34 = math.rsqrt %33 : vector<16x1xf32>
    %35 = vector.broadcast %34 : vector<16x1xf32> to vector<16x128xf32>
    %36 = arith.mulf %26, %35 : vector<16x128xf32>
    %37 = vector.broadcast %14 : vector<1x128xf32> to vector<16x128xf32>
    %38 = arith.mulf %36, %37 : vector<16x128xf32>
    %39 = vector.broadcast %15 : vector<1x128xf32> to vector<16x128xf32>
    %40 = arith.addf %38, %39 : vector<16x128xf32>
    %c0_21 = arith.constant 0 : index
    %c0_22 = arith.constant 0 : index
    %41 = vector.load %arg8[%c0_21, %c0_22] : memref<16x128xf32, #tpu.memory_space<vmem>>, vector<16x128xf32>
    tpu.vector_store %arg8[%c0_21, %c0_22], %40 {strides = array<i32>} : memref<16x128xf32, #tpu.memory_space<vmem>>, vector<16x128xf32>,
    return
  }
  func.func @transform_0(%arg0: i32) -> (i32, i32) {
    %c0_i32 = arith.constant 0 : i32
    %c0_i32_0 = arith.constant 0 : i32
    return %arg0, %c0_i32 : i32, i32
  }
  func.func @transform_1(%arg0: i32) -> (i32, i32) {
    %c0_i32 = arith.constant 0 : i32
    %c0_i32_0 = arith.constant 0 : i32
    %c0_i32_1 = arith.constant 0 : i32
    return %c0_i32, %c0_i32_0 : i32, i32
  }
  func.func @transform_2(%arg0: i32) -> (i32, i32) {
    %c0_i32 = arith.constant 0 : i32
    %c0_i32_0 = arith.constant 0 : i32
    %c0_i32_1 = arith.constant 0 : i32
    return %c0_i32, %c0_i32_0 : i32, i32
  }
  func.func @transform_3(%arg0: i32) -> (i32, i32) {
    %c0_i32 = arith.constant 0 : i32
    %c0_i32_0 = arith.constant 0 : i32
    %c0_i32_1 = arith.constant 0 : i32
    return %c0_i32, %c0_i32_0 : i32, i32
  }
  func.func @transform_4(%arg0: i32) -> (i32, i32) {
    %c0_i32 = arith.constant 0 : i32
    %c0_i32_0 = arith.constant 0 : i32
    %c0_i32_1 = arith.constant 0 : i32
    return %c0_i32, %c0_i32_0 : i32, i32
  }
  func.func @transform_5(%arg0: i32) -> (i32, i32) {
    %c0_i32 = arith.constant 0 : i32
    %c0_i32_0 = arith.constant 0 : i32
    %c0_i32_1 = arith.constant 0 : i32
    return %c0_i32, %c0_i32_0 : i32, i32
  }
  func.func @transform_6(%arg0: i32) -> (i32, i32) {
    %c0_i32 = arith.constant 0 : i32
    %c0_i32_0 = arith.constant 0 : i32
    %c0_i32_1 = arith.constant 0 : i32
    return %c0_i32, %c0_i32_0 : i32, i32
  }
  func.func @transform_7(%arg0: i32) -> (i32, i32) {
    %c0_i32 = arith.constant 0 : i32
    %c0_i32_0 = arith.constant 0 : i32
    return %arg0, %c0_i32 : i32, i32
  }
}

</mosaic_0001>

<bundles_post_ra>
// kernel: forward.1
= control target key start
LH: loop header
LB: loop body
LE: loop exit
PB: predicated region body
PF: predicated region fallthrough
CT: control target
= control target key end

     0   :  { %12 = vsyncpa [#allocation3], 0  ;;  %s691_s0 = inlined_call_operand.vmem [shape: f32[16,128], index: 0, kind: input, shape index: {}]   ;;  %s692_s1 = inlined_call_operand.hbm [shape: f32[128,128], index: 1, kind: input, shape index: {}]   ;;  %s693_s2 = inlined_call_operand.vmem [shape: f32[1,128], index: 2, kind: input, shape index: {}, may-alias: {2,4,6}]   ;;  %s694_s3 = inlined_call_operand.hbm [shape: f32[128,128], index: 3, kind: input, shape index: {}]   ;;  %s695_s4 = inlined_call_operand.vmem [shape: f32[1,128], index: 4, kind: input, shape index: {}, may-alias: {2,4,6}]   ;;  %s696_s5 = inlined_call_operand.vmem [shape: f32[1,128], index: 5, kind: input, shape index: {}]   ;;  %s697_s6 = inlined_call_operand.vmem [shape: f32[1,128], index: 6, kind: input, shape index: {}, may-alias: {2,4,6}]   ;;  %s698_s7 = inlined_call_operand.hbm [shape: f32[16,128], index: 7, kind: output, shape index: {}]  }
   0x1   :  { %13 = vsyncpa [#allocation6], 0 }
   0x2   :  { %14 = vsyncpa [#allocation4], 0  ;;  %s579_s24 = smov [#allocation2]   ;;  %s507_s28 = scalar_lea.hbm %s692_s1, 2048 }
   0x3   :  { %s22_s25 = sshll.u32 %s579_s24, 4  ;;  %p508_p0 = scmp.ne.s32.totalorder %s692_s1, %s507_s28  ;;  %s23_s25 = int_to_ptr.vmem [resolvable:$true] %s22_s25 }
   0x4   :  { %p511_p1 = scmp.lt.u32.totalorder %s507_s28, %s692_s1 }
   0x6   :  { %p513_p2 = pnand %p511_p1, %p508_p0 }
   0x8   :  { %516 = shalt.err (!%p513_p2)
}
   0x9   :  { %s517_s10 = scalar_lea.vmem %s23_s25, 2048  ;;  %p522_p4 = scmp.lt.s32.totalorder %s23_s25, %s23_s25 }
   0xa   :  { %p518_p3 = scmp.ne.s32.totalorder %s23_s25, %s517_s10  ;;  %p523_p5 = scmp.lt.s32.totalorder %s517_s10, %s517_s10 }
   0xc   :  { %p524_p6 = por %p523_p5, %p522_p4 }
   0xe   :  { %p525_p7 = pnand %p524_p6, %p518_p3 }
  0x10   :  { %528 = shalt.err (!%p525_p7)
}
  0x11   :  { %s580_s11 = smov 128   ;;  %s581_s12 = smov 8  }
  0x12   :  { %28 = dma.hbm_to_vmem [thread:$0]  %s692_s1, 2048, %s23_s25, [#allocation3], %s580_s11, %s580_s11, %s581_s12  }
  0x13   :  { %s582_s15 = smov [#allocation5]   ;;  %s529_s19 = scalar_lea.hbm %s694_s3, 2048 }
  0x14   :  { %s36_s16 = sshll.u32 %s582_s15, 4  ;;  %p530_p8 = scmp.ne.s32.totalorder %s694_s3, %s529_s19  ;;  %s37_s16 = int_to_ptr.vmem [resolvable:$true] %s36_s16 }
  0x15   :  { %p533_p9 = scmp.lt.u32.totalorder %s529_s19, %s694_s3 }
  0x17   :  { %p535_p10 = pnand %p533_p9, %p530_p8 }
  0x19   :  { %538 = shalt.err (!%p535_p10)
}
  0x1a   :  { %s539_s24 = scalar_lea.vmem %s37_s16, 2048  ;;  %p544_p12 = scmp.lt.s32.totalorder %s37_s16, %s37_s16 }
  0x1b   :  { %p540_p11 = scmp.ne.s32.totalorder %s37_s16, %s539_s24  ;;  %p545_p13 = scmp.lt.s32.totalorder %s539_s24, %s539_s24 }
  0x1d   :  { %p546_p0 = por %p545_p13, %p544_p12 }
  0x1f   :  { %p547_p1 = pnand %p546_p0, %p540_p11 }
  0x21   :  { %550 = shalt.err (!%p547_p1)
}
  0x22   :  { %42 = dma.hbm_to_vmem [thread:$0]  %s694_s3, 2048, %s37_s16, [#allocation6], %s580_s11, %s580_s11, %s581_s12  }
  0x23   :  { %573 = dma.done.wait [#allocation3], 2048  }
  0x24   :  { %574 = vsyncadd [#allocation3], 4294965248 }
  0x25   :  { %575 = dma.done.wait [#allocation6], 2048  }
  0x26   :  { %576 = vsyncadd [#allocation6], 4294965248  ;;  %v57_v0 = vld [vmem:[#allocation2] sm:$0xff]  ;;  %v58_v1 = vld [vmem:[#allocation2 + $0x8] sm:$0xff]  ;;  %s583_s13 = smov [#allocation7]  }
  0x27   :  { %v59_v2 = vld [vmem:[#allocation2 + $0x10] sm:$0xff]  ;;  %v434_v3 = vpack.c.bf16 %v58_v1, %v57_v0  ;;  %v60_v4 = vld [vmem:[#allocation2 + $0x18] sm:$0xff]  ;;  %v61_v6 = vld [vmem:[#allocation2 + $0x20] sm:$0xff]  ;;  %v269_v0 = vlaneseq  ;;  %s311_s14 = sshll.u32 %s583_s13, 4  ;;  %s312_s14 = int_to_ptr.vmem [resolvable:$true] %s311_s14 }
  0x28   :  { %v438_v5 = vpack.c.bf16 %v60_v4, %v59_v2  ;;  %v62_v7 = vld [vmem:[#allocation2 + $0x28] sm:$0xff]  ;;  %v63_v9 = vld [vmem:[#allocation2 + $0x30] sm:$0xff]  ;;  %v64_v10 = vld [vmem:[#allocation2 + $0x38] sm:$0xff]  ;;  %s551_s15 = scalar_lea.vmem %s312_s14, 256  ;;  %p556_p3 = scmp.lt.s32.totalorder %s312_s14, %s312_s14 }
  0x29   :  { %435 = vmatprep.subr.bf16.mxu0 %v434_v3  ;;  %v442_v8 = vpack.c.bf16 %v62_v7, %v61_v6  ;;  %v657_v11 = vld [vmem:[%s691_s0] sm:$0xff]  ;;  %v158_v13 = vld [vmem:[#allocation5 + $0x8] sm:$0xff]  ;;  %v159_v14 = vld [vmem:[#allocation5 + $0x10] sm:$0xff]  ;;  %v446_v20 = vpack.c.bf16 %v64_v10, %v63_v9  ;;  %v270_v1 = vand.u32 127, %v269_v0  ;;  %p552_p2 = scmp.ne.s32.totalorder %s312_s14, %s551_s15  ;;  %p557_p4 = scmp.lt.s32.totalorder %s551_s15, %s551_s15 }
  0x2a   :  { %437 = vmatpush3.bf16.msra.mxu0 %v434_v3  ;;  %396 = vmatprep.mubr.f32.mxu0 %v657_v11  ;;  %v157_v12 = vld [vmem:[#allocation5] sm:$0xff]  ;;  %v160_v16 = vld [vmem:[#allocation5 + $0x18] sm:$0xff]  ;;  %v162_v19 = vld [vmem:[#allocation5 + $0x28] sm:$0xff] }
  0x2b   :  { %439 = vmatprep.subr.bf16.mxu0 %v438_v5  ;;  %v466_v15 = vpack.c.bf16 %v158_v13, %v157_v12  ;;  %v470_v17 = vpack.c.bf16 %v160_v16, %v159_v14  ;;  %v161_v18 = vld [vmem:[#allocation5 + $0x20] sm:$0xff]  ;;  %v66_v22 = vld [vmem:[#allocation2 + $0x48] sm:$0xff]  ;;  %v163_v24 = vld [vmem:[#allocation5 + $0x30] sm:$0xff]  ;;  %vm271_vm0 = vcmp.lt.s32.totalorder %v270_v1, 32  ;;  %p558_p5 = por %p557_p4, %p556_p3 }
  0x2c   :  { %v65_v21 = vld [vmem:[#allocation2 + $0x40] sm:$0xff]  ;;  %v474_v23 = vpack.c.bf16 %v162_v19, %v161_v18  ;;  %v164_v25 = vld [vmem:[#allocation5 + $0x38] sm:$0xff]  ;;  %v67_v27 = vld [vmem:[#allocation2 + $0x50] sm:$0xff] }
  0x2d   :  { %467 = vmatprep.subr.bf16.mxu1 %v466_v15  ;;  %v450_v26 = vpack.c.bf16 %v66_v22, %v65_v21  ;;  %v68_v28 = vld [vmem:[#allocation2 + $0x58] sm:$0xff]  ;;  %v478_v29 = vpack.c.bf16 %v164_v25, %v163_v24  ;;  %v165_v30 = vld [vmem:[#allocation5 + $0x40] sm:$0xff]  ;;  %v166_v31 = vld [vmem:[#allocation5 + $0x48] sm:$0xff]  ;;  %p559_p6 = pnand %p558_p5, %p552_p2 }
  0x2e   :  { %441 = vmatpush3.bf16.msra.mxu0 %v438_v5  ;;  %469 = vmatpush3.bf16.msra.mxu1 %v466_v15  ;;  %v454_v32 = vpack.c.bf16 %v68_v28, %v67_v27  ;;  %v69_v33 = vld [vmem:[#allocation2 + $0x60] sm:$0xff]  ;;  %v70_v34 = vld [vmem:[#allocation2 + $0x68] sm:$0xff]  ;;  %v482_v35 = vpack.c.bf16 %v166_v31, %v165_v30  ;;  %v167_v36 = vld [vmem:[#allocation5 + $0x50] sm:$0xff] }
  0x2f   :  { %443 = vmatprep.subr.bf16.mxu0 %v442_v8  ;;  %471 = vmatprep.subr.bf16.mxu1 %v470_v17  ;;  %v168_v37 = vld [vmem:[#allocation5 + $0x58] sm:$0xff]  ;;  %v458_v38 = vpack.c.bf16 %v70_v34, %v69_v33  ;;  %v71_v39 = vld [vmem:[#allocation2 + $0x70] sm:$0xff]  ;;  %v169_v42 = vld [vmem:[#allocation5 + $0x60] sm:$0xff] }
  0x30   :  { %v72_v40 = vld [vmem:[#allocation2 + $0x78] sm:$0xff]  ;;  %v486_v41 = vpack.c.bf16 %v168_v37, %v167_v36  ;;  %v170_v43 = vld [vmem:[#allocation5 + $0x68] sm:$0xff]  ;;  %v171_v47 = vld [vmem:[#allocation5 + $0x70] sm:$0xff] }
  0x31   :  { %v462_v44 = vpack.c.bf16 %v72_v40, %v71_v39  ;;  %v490_v45 = vpack.c.bf16 %v170_v43, %v169_v42  ;;  %v56_v46 = vld [vmem:[%s691_s0 + $0x8] sm:$0xff]  ;;  %v172_v48 = vld [vmem:[#allocation5 + $0x78] sm:$0xff]  ;;  %v324_v50 = vld [vmem:[%s693_s2] ss:$0 sm:$0xff] }
  0x32   :  { %445 = vmatpush3.bf16.msra.mxu0 %v442_v8  ;;  %473 = vmatpush3.bf16.msra.mxu1 %v470_v17  ;;  %v494_v49 = vpack.c.bf16 %v172_v48, %v171_v47  ;;  %v325_v59 = vld [vmem:[%s695_s4] ss:$0 sm:$0xff] }
  0x33   :  { %447 = vmatprep.subr.bf16.mxu0 %v446_v20  ;;  %475 = vmatprep.subr.bf16.mxu1 %v474_v23  ;;  %v326_v19 = vld [vmem:[%s696_s5] ss:$0 sm:$0xff] }
  0x34   :  { %v327_v21 = vld [vmem:[%s697_s6] ss:$0 sm:$0xff] }
  0x36   :  { %449 = vmatpush3.bf16.msra.mxu0 %v446_v20  ;;  %477 = vmatpush3.bf16.msra.mxu1 %v474_v23 }
  0x37   :  { %451 = vmatprep.subr.bf16.mxu0 %v450_v26  ;;  %479 = vmatprep.subr.bf16.mxu1 %v478_v29 }
  0x3a   :  { %453 = vmatpush3.bf16.msra.mxu0 %v450_v26  ;;  %481 = vmatpush3.bf16.msra.mxu1 %v478_v29 }
  0x3b   :  { %455 = vmatprep.subr.bf16.mxu0 %v454_v32  ;;  %483 = vmatprep.subr.bf16.mxu1 %v482_v35 }
  0x3e   :  { %457 = vmatpush3.bf16.msra.mxu0 %v454_v32  ;;  %485 = vmatpush3.bf16.msra.mxu1 %v482_v35 }
  0x3f   :  { %459 = vmatprep.subr.bf16.mxu0 %v458_v38  ;;  %487 = vmatprep.subr.bf16.mxu1 %v486_v41 }
  0x42   :  { %461 = vmatpush3.bf16.msra.mxu0 %v458_v38  ;;  %489 = vmatpush3.bf16.msra.mxu1 %v486_v41 }
  0x43   :  { %463 = vmatprep.subr.bf16.mxu0 %v462_v44  ;;  %491 = vmatprep.subr.bf16.mxu1 %v490_v45 }
  0x46   :  { %465 = vmatpush3.bf16.msra.mxu0 %v462_v44  ;;  %493 = vmatpush3.bf16.msra.mxu1 %v490_v45 }
  0x47   :  { %495 = vmatprep.subr.bf16.mxu1 %v494_v49 }
  0x49   :  { %397 = vmatmul.mubr.f32.vlgmr.msra.gmra.mrb[0].mxu0 %v56_v46 }
  0x4a   :  { %497 = vmatpush3.bf16.msra.mxu1 %v494_v49 }
 0x11c   :  { %v398_v51 = vpop.f32.mrb[0].mxu0 }
 0x11d   :  { %v152_v52 = vadd.f32 %v398_v51, %v324_v50  ;;  %v146_v53 = vpop.f32.mrb[1].mxu0 }
 0x11e   :  { %v147_v54 = vadd.f32 %v324_v50, %v146_v53 }
 0x11f   :  { %v156_v56 = vmax.f32 %v152_v52, 0.0 }
 0x120   :  { %v155_v55 = vmax.f32 %v147_v54, 0.0 }
 0x122   :  { %431 = vmatprep.mubr.f32.mxu1 %v155_v55 }
 0x123   :  { %432 = vmatmul.mubr.f32.vlgmr.msra.gmra.mrb[0].mxu1 %v156_v56 }
 0x1f6   :  { %v433_v57 = vpop.f32.mrb[0].mxu1 }
 0x1f7   :  { %v239_v58 = vpop.f32.mrb[1].mxu1  ;;  %v249_v61 = vadd.f32 %v433_v57, %v56_v46 }
 0x1f8   :  { %v248_v60 = vadd.f32 %v239_v58, %v657_v11 }
 0x1f9   :  { %v258_v63 = vadd.f32 %v325_v59, %v249_v61 }
 0x1fa   :  { %v257_v62 = vadd.f32 %v325_v59, %v248_v60 }
 0x1fc   :  { %261 = vadd.xlane.f32.xlu0 %v257_v62 }
 0x200   :  { %263 = vadd.xlane.f32.xlu0 %v258_v63 }
 0x289   :  { %v262_v2 = vpop.xlane.xlu0 %261 }
 0x28a   :  { %v265_v3 = vmul.f32 0.03125, %v262_v2 }
 0x28c   :  { %v267_v4 = vsub.f32 %v257_v62, %v265_v3 }
 0x28d   :  { %v264_v5 = vpop.xlane.xlu0 %263 }
 0x28e   :  { %v266_v6 = vmul.f32 0.03125, %v264_v5  ;;  %v272_v7 = vsel %vm271_vm0, %v267_v4, 0.0 }
 0x28f   :  { %v274_v8 = vmul.f32 %v272_v7, %v272_v7 }
 0x290   :  { %v268_v9 = vsub.f32 %v258_v63, %v266_v6 }
 0x291   :  { %276 = vadd.xlane.f32.xlu1 %v274_v8 }
 0x292   :  { %v273_v10 = vsel %vm271_vm0, %v268_v9, 0.0 }
 0x293   :  { %v275_v12 = vmul.f32 %v273_v10, %v273_v10 }
 0x295   :  { %278 = vadd.xlane.f32.xlu1 %v275_v12 }
 0x31e   :  { %v277_v11 = vpop.xlane.xlu1 %276 }
 0x31f   :  { %v280_v13 = vmul.f32 0.03125, %v277_v11 }
 0x321   :  { %v282_v14 = vadd.f32 1e-05, %v280_v13 }
 0x322   :  { %v279_v15 = vpop.xlane.xlu1 %278 }
 0x323   :  { %503 = vrsqrt.f32 %v282_v14  ;;  %v281_v16 = vmul.f32 0.03125, %v279_v15 }
 0x325   :  { %v283_v17 = vadd.f32 1e-05, %v281_v16 }
 0x327   :  { %505 = vrsqrt.f32 %v283_v17 }
 0x32d   :  { %v504_v18 = vpop.eup %503 }
 0x32e   :  { %v286_v20 = vmul.f32 %v504_v18, %v272_v7 }
 0x330   :  { %v294_v22 = vmul.f32 %v326_v19, %v286_v20 }
 0x331   :  { %v506_v23 = vpop.eup %505 }
 0x332   :  { %v287_v24 = vmul.f32 %v506_v23, %v273_v10  ;;  %v302_v25 = vadd.f32 %v327_v21, %v294_v22 }
 0x334   :  { %v295_v26 = vmul.f32 %v326_v19, %v287_v24  ;;  %304 = vst [vmem:[#allocation7] sm:$0xff] %v302_v25 }
 0x336   :  { %v303_v27 = vadd.f32 %v327_v21, %v295_v26 }
 0x338   :  { %305 = vst [vmem:[#allocation7 + $0x8] sm:$0xff] %v303_v27 }
 0x339   :  { %562 = shalt.err (!%p559_p6)
}
 0x33a   :  { %s563_s16 = scalar_lea.hbm %s698_s7, 256 }
 0x33b   :  { %p564_p7 = scmp.ne.s32.totalorder %s698_s7, %s563_s16  ;;  %p567_p8 = scmp.lt.u32.totalorder %s563_s16, %s698_s7 }
 0x33d   :  { %p569_p9 = pnand %p567_p8, %p564_p7 }
 0x33f   :  { %572 = shalt.err (!%p569_p9)
}
 0x340   :  { %317 = dma.vmem_to_hbm [thread:$0]  %s312_s14, 256, %s698_s7, [#allocation4], %s580_s11, %s580_s11, %s581_s12  }
 0x341   :  { %577 = dma.done.wait [#allocation4], 256  }
 0x342   :  { %578 = vsyncadd [#allocation4], 4294967040 }
 0x343   :  { %321 = vsyncpa [#allocation3], 1 }
 0x344   :  { %322 = vsyncpa [#allocation6], 1 }
 0x345   :  { %323 = vsyncpa [#allocation4], 1 }

</bundles_post_ra>
